<compile_context>
chip_gen: v7x
topology: tpu7x:2x2x1
jax: 0.10.0
libtpu: 0.0.40
codegen_flags: <defaults>
</compile_context>

<pallas_src>
import functools

import jax
import jax.numpy as jnp
from jax.experimental import pallas as pl
from jax.experimental.pallas import tpu as pltpu


# ---------------------------------------------------------------------------
# Fused kernel: all GCN layers in one call.
#   grid = (n_layers, n_row_tiles)   -- layer axis outermost (sequential carry)
#   refs : a_ref    (Np, Np)  bf16  normalized adjacency, VMEM-resident (1 buffer)
#          hw0_hbm  (Np, Fp)  bf16  X @ W_0 in HBM (copied once into hw scratch)
#          w_ref    (Fp, Fp)  bf16  W_{l+1} (unused on the last layer)
#          b/g/be   (1,  Fp)  f32   layer-l bias / LN gamma / LN beta
#          o_hbm    (Np, Fp)  f32   output in HBM (written only on the last layer)
#   scratch: hw_ref (2, Np, Fp) bf16  HW ping-pong (layer carry)
#            y_ref  (TM, Fp)    f32   last-layer output staging
#            sem    ()                DMA semaphore for the manual copies
# ---------------------------------------------------------------------------
def _gcn_fused_kernel(dout, eps, n_layers,
                      a_ref, hw0_hbm, w_ref, b_ref, g_ref, be_ref,
                      o_hbm, hw_ref, y_ref, sem):
    layer = pl.program_id(0)
    row = pl.program_id(1)
    tm = y_ref.shape[0]
    fp = y_ref.shape[1]

    # One-time: DMA the precomputed X @ W_0 into slot 0 of the HW carry.
    @pl.when((layer == 0) & (row == 0))
    def _load_hw0():
        cp = pltpu.make_async_copy(hw0_hbm, hw_ref.at[0], sem)
        cp.start()
        cp.wait()

    slot = jax.lax.rem(layer, 2)
    row0 = pl.multiple_of(row * tm, tm)

    # Aggregation for this row strip: A_hat[rows, :] @ (H_l W_l)  (bf16 x bf16 -> f32 MXU)
    a_strip = a_ref[pl.ds(row0, tm), :]
    agg = jnp.dot(a_strip, hw_ref[slot], preferred_element_type=jnp.float32)
    # Bias AFTER the aggregation (A @ (H W) + b), matching PyG GCNConv.
    agg = agg + b_ref[...]

    # LayerNorm over the real dout features.  Padded columns of agg are exactly
    # zero (W/b padding is zero), so the mean needs no mask; the centered term does.
    col = jax.lax.broadcasted_iota(jnp.int32, (1, fp), 1)
    mask = col < dout
    inv_d = 1.0 / float(dout)
    mean = jnp.sum(agg, axis=-1, keepdims=True) * inv_d
    diff = jnp.where(mask, agg - mean, 0.0)
    var = jnp.sum(diff * diff, axis=-1, keepdims=True) * inv_d
    y = diff * jax.lax.rsqrt(var + eps)
    y = y * g_ref[...] + be_ref[...]          # padded cols: gamma = beta = 0 -> stay 0
    y = jnp.maximum(y, 0.0)                   # ReLU; dropout is identity in eval

    # Non-final layer: carry HW, not H -- push this strip through W_{l+1} into the
    # other slot right away (spreads the matmul evenly over row tiles, bf16 carry).
    @pl.when(layer < n_layers - 1)
    def _next_hw():
        hw_next = jnp.dot(y.astype(jnp.bfloat16), w_ref[...],
                          preferred_element_type=jnp.float32)
        hw_ref[1 - slot, pl.ds(row0, tm), :] = hw_next.astype(jnp.bfloat16)

    # Final layer: stage the strip and DMA it straight to the HBM output.
    @pl.when(layer == n_layers - 1)
    def _write_out():
        y_ref[...] = y
        cp = pltpu.make_async_copy(y_ref, o_hbm.at[pl.ds(row0, tm), :], sem)
        cp.start()
        cp.wait()


# ---------------------------------------------------------------------------
# Wrapper: padding, parameter stacking, pallas_call
# ---------------------------------------------------------------------------
def _round_up(v, m):
    return (v + m - 1) // m * m


def _pad2(a, rows, cols):
    return jnp.pad(a, ((0, rows - a.shape[0]), (0, cols - a.shape[1])))


def gcn_backbone_forward(x, a_hat, params, *, eps=1e-5, tm_target=256):
    """Fused multi-layer GCN forward. params = [(W, b, gamma, beta), ...]."""
    n, din = x.shape
    n_layers = len(params)
    dout = params[0][0].shape[1]

    # Lane-pad feature dims to a multiple of 128 (lane-dense loads, full MXU cols).
    fp = _round_up(max(din, dout), 128)

    # Node/row padding: A is padded in both dims to n_row_tiles * tm, so pick tm
    # to minimize quadratic padding of A.
    # TODO(synk): pass tm_target=128 on v5e (128x128 MXU, 16 MiB default VMEM).
    np8 = _round_up(n, 8)
    if np8 <= tm_target:
        tm = np8
    else:
        cands = [c for c in (128, 256, 512) if c <= tm_target] or [128]
        tm = min(cands, key=lambda c: (_round_up(np8, c), -c))
    np_pad = _round_up(np8, tm)
    n_row_tiles = np_pad // tm

    # TODO(synk): bf16 A loses ~3 digits of the D^{-1/2} normalization vs PyG's f32;
    #             keep f32 (or fp8+scale on v7x / int8+scale on v6e) per accuracy target.
    a_pad = _pad2(a_hat, np_pad, np_pad).astype(jnp.bfloat16)
    x_pad = _pad2(x, np_pad, fp).astype(jnp.bfloat16)

    # Layer-0 HW precomputed here (one small XLA matmul) so x never sits in VMEM.
    w0_pad = _pad2(params[0][0], fp, fp).astype(jnp.bfloat16)
    hw0 = jnp.dot(x_pad, w0_pad, preferred_element_type=jnp.float32).astype(jnp.bfloat16)

    # Grid step of layer l computes HW for layer l+1 -> feed W_{l+1}; last slot unused.
    w_next = [params[l + 1][0] for l in range(n_layers - 1)] + [params[-1][0]]
    w_st = jnp.stack([_pad2(w, fp, fp) for w in w_next]).astype(jnp.bfloat16)
    b_st = jnp.stack([_pad2(b[None, :], 1, fp) for (_, b, _, _) in params]).astype(jnp.float32)
    g_st = jnp.stack([_pad2(g[None, :], 1, fp) for (_, _, g, _) in params]).astype(jnp.float32)
    be_st = jnp.stack([_pad2(be[None, :], 1, fp) for (_, _, _, be) in params]).astype(jnp.float32)

    # Explicit VMEM budget: resident A (1 buffer) + HW ping-pong + double-buffered W
    # + staging + small vectors, with headroom.
    # TODO(synk): clamp to <= ~56 MiB and shrink tm on v7x (64 MiB physical VMEM).
    needed = (np_pad * np_pad * 2 + 2 * np_pad * fp * 2 + 2 * fp * fp * 2
              + tm * fp * 4 + 6 * 8 * fp * 4)
    vmem_limit = int(min(max(2 * needed, 32 << 20), 96 << 20))

    kernel = functools.partial(_gcn_fused_kernel, dout, eps, n_layers)

    out = pl.pallas_call(
        kernel,
        out_shape=jax.ShapeDtypeStruct((np_pad, fp), jnp.float32),
        grid_spec=pltpu.PrefetchScalarGridSpec(
            num_scalar_prefetch=0,
            grid=(n_layers, n_row_tiles),
            in_specs=[
                # A_hat: VMEM-resident, DMA'd once (constant block index, single buffer).
                pl.BlockSpec((np_pad, np_pad), lambda l, r: (0, 0),
                             pipeline_mode=pl.Buffered(1)),
                # X @ W_0 stays in HBM; copied once into the hw scratch by the kernel.
                pl.BlockSpec(memory_space=pl.ANY),
                pl.BlockSpec((None, fp, fp), lambda l, r: (l, 0, 0)),   # W_{l+1}
                pl.BlockSpec((None, 1, fp), lambda l, r: (l, 0, 0)),    # b_l
                pl.BlockSpec((None, 1, fp), lambda l, r: (l, 0, 0)),    # gamma_l
                pl.BlockSpec((None, 1, fp), lambda l, r: (l, 0, 0)),    # beta_l
            ],
            # Output stays in HBM; only the last layer DMAs its strips out.
            out_specs=pl.BlockSpec(memory_space=pl.ANY),
            scratch_shapes=[
                pltpu.VMEM((2, np_pad, fp), jnp.bfloat16),  # HW ping-pong (layer carry)
                pltpu.VMEM((tm, fp), jnp.float32),          # last-layer output staging
                pltpu.SemaphoreType.DMA(()),                # manual-copy semaphore
            ],
        ),
        compiler_params=pltpu.CompilerParams(
            # Layer axis is a sequential carry; the row axis reads/writes the
            # per-core HW scratch, so it must also stay "arbitrary" (megacore
            # sharding would split the carried state across cores).
            dimension_semantics=("arbitrary", "arbitrary"),
            vmem_limit_bytes=vmem_limit,
        ),
    )(a_pad, hw0, w_st, b_st, g_st, be_st)

    return out[:n, :dout]


# ---------------------------------------------------------------------------
# Glue: normalized adjacency + parameter init
# ---------------------------------------------------------------------------
def build_normalized_adjacency(edge_index, num_nodes):
    """Dense A_hat = D^{-1/2} (A + I) D^{-1/2}  (GCNConv default normalization)."""
    src, dst = edge_index
    adj = jnp.zeros((num_nodes, num_nodes), dtype=jnp.float32)
    adj = adj.at[dst, src].add(1.0)                      # aggregate src -> dst
    adj = adj + jnp.eye(num_nodes, dtype=jnp.float32)    # self loops
    deg = jnp.sum(adj, axis=1)
    dinv = jnp.where(deg > 0, 1.0 / jnp.sqrt(deg), 0.0)
    return adj * dinv[:, None] * dinv[None, :]


def init_params(key, din, dout, n_layers):
    params = []
    d_in = din
    for _ in range(n_layers):
        key, kw, kb, kg, kbe = jax.random.split(key, 5)
        scale = 1.0 / jnp.sqrt(jnp.float32(d_in))
        w = jax.random.uniform(kw, (d_in, dout), jnp.float32, -scale, scale)
        b = 0.1 * jax.random.normal(kb, (dout,), jnp.float32)
        gamma = 1.0 + 0.1 * jax.random.normal(kg, (dout,), jnp.float32)
        beta = 0.1 * jax.random.normal(kbe, (dout,), jnp.float32)
        params.append((w, b, gamma, beta))
        d_in = dout
    return params


# ---------------------------------------------------------------------------
# Pure-JAX reference (same bf16-operand / f32-accumulate precision as the kernel)
# ---------------------------------------------------------------------------
def reference_forward(x, a_hat, params, eps=1e-5):
    h = x
    a_bf = a_hat.astype(jnp.bfloat16)
    for (w, b, gamma, beta) in params:
        hw = jnp.dot(h.astype(jnp.bfloat16), w.astype(jnp.bfloat16),
                     preferred_element_type=jnp.float32)
        agg = jnp.dot(a_bf, hw.astype(jnp.bfloat16),
                      preferred_element_type=jnp.float32) + b   # bias AFTER aggregation
        mean = agg.mean(-1, keepdims=True)
        var = ((agg - mean) ** 2).mean(-1, keepdims=True)
        h = jnp.maximum((agg - mean) * jax.lax.rsqrt(var + eps) * gamma + beta, 0.0)
    return h


if __name__ == "__main__":
    key = jax.random.PRNGKey(0)

    num_nodes = 16   # N
    din = 8          # input feature dim
    dout = 32        # cfg.dout
    n_layers = 2     # cfg.n_layers

    k_x, k_p = jax.random.split(key)
    x = jax.random.normal(k_x, (num_nodes, din), jnp.float32)

    # Ring graph + a few chords (directed edges; self-loops added in A_hat).
    src = jnp.concatenate([jnp.arange(num_nodes), jnp.arange(num_nodes)])
    dst = jnp.concatenate([(jnp.arange(num_nodes) + 1) % num_nodes,
                           (jnp.arange(num_nodes) + 3) % num_nodes])
    edge_index = jnp.stack([src, dst]).astype(jnp.int32)

    a_hat = build_normalized_adjacency(edge_index, num_nodes)
    params = init_params(k_p, din, dout, n_layers)

    out = jax.block_until_ready(gcn_backbone_forward(x, a_hat, params))
    ref = reference_forward(x, a_hat, params)

    assert out.shape == (num_nodes, dout)
    err = float(jnp.max(jnp.abs(out - ref)))
    assert jnp.allclose(out, ref, atol=2e-3, rtol=2e-3), f"mismatch vs reference: {err}"

    print("KERNEL_OK")
</pallas_src>

<mosaic_0001>
module attributes {stable_mosaic.version = 11 : i64} {
  func.func @_gcn_fused_kernel(%arg0: i32, %arg1: i32, %arg2: memref<16x16xbf16, #tpu.memory_space<vmem>>, %arg3: memref<16x128xbf16, #tpu.memory_space<any>>, %arg4: memref<1x128x128xbf16, #tpu.memory_space<vmem>>, %arg5: memref<1x1x128xf32, #tpu.memory_space<vmem>>, %arg6: memref<1x1x128xf32, #tpu.memory_space<vmem>>, %arg7: memref<1x1x128xf32, #tpu.memory_space<vmem>>, %arg8: memref<16x128xf32, #tpu.memory_space<any>>, %arg9: memref<2x16x128xbf16, #tpu.memory_space<vmem>>, %arg10: memref<16x128xf32, #tpu.memory_space<vmem>>, %arg11: memref<!tpu.dma_semaphore, #tpu.memory_space<semaphore_mem>>) attributes {dimension_semantics = [#tpu.dimension_semantics<arbitrary>, #tpu.dimension_semantics<arbitrary>], iteration_bounds = array<i64: 2, 1>, scalar_prefetch = 0 : i64, scratch_operands = 3 : i64, tpu.core_type = #tpu.core_type<tc>, window_params = [{pipeline_mode = #tpu.pipeline_mode<synchronous>, transform_indices = @transform_0, window_bounds = array<i64: 16, 16>}, {}, {transform_indices = @transform_2, window_bounds = array<i64: 1, 128, 128>}, {transform_indices = @transform_3, window_bounds = array<i64: 1, 1, 128>}, {transform_indices = @transform_4, window_bounds = array<i64: 1, 1, 128>}, {transform_indices = @transform_5, window_bounds = array<i64: 1, 1, 128>}, {}]} {
    %c0_i32 = arith.constant 0 : i32
    %0 = arith.cmpi eq, %arg0, %c0_i32 : i32
    %c0_i32_0 = arith.constant 0 : i32
    %1 = arith.cmpi eq, %arg1, %c0_i32_0 : i32
    %2 = arith.andi %0, %1 : i1
    %3 = arith.extui %2 : i1 to i32
    %c0_i32_1 = arith.constant 0 : i32
    %4 = arith.cmpi ne, %3, %c0_i32_1 : i32
    scf.if %4 {
      %c0_i32_23 = arith.constant 0 : i32
      %c0_i32_24 = arith.constant 0 : i32
      %c0_i32_25 = arith.constant 0 : i32
      %57 = tpu.memref_slice %arg9[%c0_i32_23, %c0_i32_24, %c0_i32_25] : memref<2x16x128xbf16, #tpu.memory_space<vmem>> -> memref<1x16x128xbf16, #tpu.memory_space<vmem>>
      %58 = tpu.memref_squeeze %57 : memref<1x16x128xbf16, #tpu.memory_space<vmem>> -> memref<16x128xbf16, #tpu.memory_space<vmem>>
      tpu.enqueue_dma source(%arg3 : memref<16x128xbf16, #tpu.memory_space<any>>) target(%58 : memref<16x128xbf16, #tpu.memory_space<vmem>>) target_semaphore(%arg11 : memref<!tpu.dma_semaphore, #tpu.memory_space<semaphore_mem>>)
      %c0_i32_26 = arith.constant 0 : i32
      %c0_i32_27 = arith.constant 0 : i32
      %c0_i32_28 = arith.constant 0 : i32
      %59 = tpu.memref_slice %arg9[%c0_i32_26, %c0_i32_27, %c0_i32_28] : memref<2x16x128xbf16, #tpu.memory_space<vmem>> -> memref<1x16x128xbf16, #tpu.memory_space<vmem>>
      %60 = tpu.memref_squeeze %59 : memref<1x16x128xbf16, #tpu.memory_space<vmem>> -> memref<16x128xbf16, #tpu.memory_space<vmem>>
      tpu.wait_dma2 semaphore(%arg11 : memref<!tpu.dma_semaphore, #tpu.memory_space<semaphore_mem>>) src(%arg3 : memref<16x128xbf16, #tpu.memory_space<any>>) dst(%60 : memref<16x128xbf16, #tpu.memory_space<vmem>>)
    } else {
    }
    %c2_i32 = arith.constant 2 : i32
    %5 = arith.remsi %arg0, %c2_i32 : i32
    %c16_i32 = arith.constant 16 : i32
    %6 = arith.muli %arg1, %c16_i32 : i32
    %7 = tpu.assume_multiple %6, 16 : i32
    %8 = arith.index_cast %7 : i32 to index
    %c0 = arith.constant 0 : index
    %9 = vector.load %arg2[%8, %c0] : memref<16x16xbf16, #tpu.memory_space<vmem>>, vector<16x16xbf16>
    %10 = arith.index_cast %5 : i32 to index
    %c0_2 = arith.constant 0 : index
    %c0_3 = arith.constant 0 : index
    %11 = vector.load %arg9[%10, %c0_2, %c0_3] : memref<2x16x128xbf16, #tpu.memory_space<vmem>>, vector<1x16x128xbf16>
    %12 = vector.shape_cast %11 : vector<1x16x128xbf16> to vector<16x128xbf16>
    %cst = arith.constant dense<0.000000e+00> : vector<16x128xf32>
    %13 = tpu.matmul %9, %12, %cst {dimension_numbers = #tpu.dot_dimension_numbers<[1], [0], [0], [1], [0, 0, 1, 1], [], []>} : vector<16x16xbf16>, vector<16x128xbf16>, vector<16x128xf32> -> vector<16x128xf32>
    %c0_4 = arith.constant 0 : index
    %c0_5 = arith.constant 0 : index
    %c0_6 = arith.constant 0 : index
    %14 = vector.load %arg5[%c0_4, %c0_5, %c0_6] : memref<1x1x128xf32, #tpu.memory_space<vmem>>, vector<1x1x128xf32>
    %15 = vector.shape_cast %14 : vector<1x1x128xf32> to vector<1x128xf32>
    %16 = vector.broadcast %15 : vector<1x128xf32> to vector<16x128xf32>
    %17 = arith.addf %13, %16 : vector<16x128xf32>
    %18 = tpu.iota {dimensions = array<i32: 1>} : vector<1x128xi32>
    %c32_i32 = arith.constant 32 : i32
    %19 = vector.broadcast %c32_i32 : i32 to vector<1x128xi32>
    %20 = arith.cmpi slt, %18, %19 : vector<1x128xi32>
    %cst_7 = arith.constant dense<0.000000e+00> : vector<16xf32>
    %21 = vector.multi_reduction <add>, %17, %cst_7 [1] : vector<16x128xf32> to vector<16xf32>
    %22 = vector.shape_cast %21 : vector<16xf32> to vector<16x1xf32>
    %cst_8 = arith.constant 3.125000e-02 : f32
    %23 = vector.broadcast %cst_8 : f32 to vector<16x1xf32>
    %24 = arith.mulf %22, %23 : vector<16x1xf32>
    %25 = vector.broadcast %24 : vector<16x1xf32> to vector<16x128xf32>
    %26 = arith.subf %17, %25 : vector<16x128xf32>
    %cst_9 = arith.constant 0.000000e+00 : f32
    %27 = vector.shape_cast %20 : vector<1x128xi1> to vector<1x128xi1>
    %28 = vector.broadcast %27 : vector<1x128xi1> to vector<16x128xi1>
    %29 = vector.broadcast %cst_9 : f32 to vector<16x128xf32>
    %30 = arith.select %28, %26, %29 : vector<16x128xi1>, vector<16x128xf32>
    %31 = arith.mulf %30, %30 : vector<16x128xf32>
    %cst_10 = arith.constant dense<0.000000e+00> : vector<16xf32>
    %32 = vector.multi_reduction <add>, %31, %cst_10 [1] : vector<16x128xf32> to vector<16xf32>
    %33 = vector.shape_cast %32 : vector<16xf32> to vector<16x1xf32>
    %cst_11 = arith.constant 3.125000e-02 : f32
    %34 = vector.broadcast %cst_11 : f32 to vector<16x1xf32>
    %35 = arith.mulf %33, %34 : vector<16x1xf32>
    %cst_12 = arith.constant 9.99999974E-6 : f32
    %36 = vector.broadcast %cst_12 : f32 to vector<16x1xf32>
    %37 = arith.addf %35, %36 : vector<16x1xf32>
    %38 = math.rsqrt %37 : vector<16x1xf32>
    %39 = vector.broadcast %38 : vector<16x1xf32> to vector<16x128xf32>
    %40 = arith.mulf %30, %39 : vector<16x128xf32>
    %c0_13 = arith.constant 0 : index
    %c0_14 = arith.constant 0 : index
    %c0_15 = arith.constant 0 : index
    %41 = vector.load %arg6[%c0_13, %c0_14, %c0_15] : memref<1x1x128xf32, #tpu.memory_space<vmem>>, vector<1x1x128xf32>
    %42 = vector.shape_cast %41 : vector<1x1x128xf32> to vector<1x128xf32>
    %43 = vector.broadcast %42 : vector<1x128xf32> to vector<16x128xf32>
    %44 = arith.mulf %40, %43 : vector<16x128xf32>
    %c0_16 = arith.constant 0 : index
    %c0_17 = arith.constant 0 : index
    %c0_18 = arith.constant 0 : index
    %45 = vector.load %arg7[%c0_16, %c0_17, %c0_18] : memref<1x1x128xf32, #tpu.memory_space<vmem>>, vector<1x1x128xf32>
    %46 = vector.shape_cast %45 : vector<1x1x128xf32> to vector<1x128xf32>
    %47 = vector.broadcast %46 : vector<1x128xf32> to vector<16x128xf32>
    %48 = arith.addf %44, %47 : vector<16x128xf32>
    %cst_19 = arith.constant 0.000000e+00 : f32
    %49 = vector.broadcast %cst_19 : f32 to vector<16x128xf32>
    %50 = arith.maximumf %48, %49 : vector<16x128xf32>
    %c1_i32 = arith.constant 1 : i32
    %51 = arith.cmpi slt, %arg0, %c1_i32 : i32
    %52 = arith.extui %51 : i1 to i32
    %c0_i32_20 = arith.constant 0 : i32
    %53 = arith.cmpi ne, %52, %c0_i32_20 : i32
    scf.if %53 {
      %57 = arith.truncf %50 : vector<16x128xf32> to vector<16x128xbf16>
      %c0_23 = arith.constant 0 : index
      %c0_24 = arith.constant 0 : index
      %c0_25 = arith.constant 0 : index
      %58 = vector.load %arg4[%c0_23, %c0_24, %c0_25] : memref<1x128x128xbf16, #tpu.memory_space<vmem>>, vector<1x128x128xbf16>
      %59 = vector.shape_cast %58 : vector<1x128x128xbf16> to vector<128x128xbf16>
      %cst_26 = arith.constant dense<0.000000e+00> : vector<16x128xf32>
      %60 = tpu.matmul %57, %59, %cst_26 {dimension_numbers = #tpu.dot_dimension_numbers<[1], [0], [0], [1], [0, 0, 1, 1], [], []>} : vector<16x128xbf16>, vector<128x128xbf16>, vector<16x128xf32> -> vector<16x128xf32>
      %61 = arith.truncf %60 : vector<16x128xf32> to vector<16x128xbf16>
      %c1_i32_27 = arith.constant 1 : i32
      %62 = arith.subi %c1_i32_27, %5 : i32
      %63 = arith.index_cast %62 : i32 to index
      %64 = arith.index_cast %7 : i32 to index
      %c0_28 = arith.constant 0 : index
      %65 = vector.load %arg9[%63, %64, %c0_28] : memref<2x16x128xbf16, #tpu.memory_space<vmem>>, vector<1x16x128xbf16>
      %66 = vector.shape_cast %65 : vector<1x16x128xbf16> to vector<16x128xbf16>
      %67 = vector.shape_cast %61 : vector<16x128xbf16> to vector<1x16x128xbf16>
      tpu.vector_store %arg9[%63, %64, %c0_28], %67 {strides = array<i32>} : memref<2x16x128xbf16, #tpu.memory_space<vmem>>, vector<1x16x128xbf16>,
    } else {
    }
    %c1_i32_21 = arith.constant 1 : i32
    %54 = arith.cmpi eq, %arg0, %c1_i32_21 : i32
    %55 = arith.extui %54 : i1 to i32
    %c0_i32_22 = arith.constant 0 : i32
    %56 = arith.cmpi ne, %55, %c0_i32_22 : i32
    scf.if %56 {
      %c0_23 = arith.constant 0 : index
      %c0_24 = arith.constant 0 : index
      %57 = vector.load %arg10[%c0_23, %c0_24] : memref<16x128xf32, #tpu.memory_space<vmem>>, vector<16x128xf32>
      tpu.vector_store %arg10[%c0_23, %c0_24], %50 {strides = array<i32>} : memref<16x128xf32, #tpu.memory_space<vmem>>, vector<16x128xf32>,
      %c0_i32_25 = arith.constant 0 : i32
      %58 = tpu.memref_slice %arg8[%7, %c0_i32_25] : memref<16x128xf32, #tpu.memory_space<any>> -> memref<16x128xf32, #tpu.memory_space<any>>
      tpu.enqueue_dma source(%arg10 : memref<16x128xf32, #tpu.memory_space<vmem>>) target(%58 : memref<16x128xf32, #tpu.memory_space<any>>) target_semaphore(%arg11 : memref<!tpu.dma_semaphore, #tpu.memory_space<semaphore_mem>>)
      %c0_i32_26 = arith.constant 0 : i32
      %59 = tpu.memref_slice %arg8[%7, %c0_i32_26] : memref<16x128xf32, #tpu.memory_space<any>> -> memref<16x128xf32, #tpu.memory_space<any>>
      tpu.wait_dma2 semaphore(%arg11 : memref<!tpu.dma_semaphore, #tpu.memory_space<semaphore_mem>>) src(%arg10 : memref<16x128xf32, #tpu.memory_space<vmem>>) dst(%59 : memref<16x128xf32, #tpu.memory_space<any>>)
    } else {
    }
    return
  }
  func.func @transform_0(%arg0: i32, %arg1: i32) -> (i32, i32) {
    %c0_i32 = arith.constant 0 : i32
    %c0_i32_0 = arith.constant 0 : i32
    %c0_i32_1 = arith.constant 0 : i32
    return %c0_i32, %c0_i32_0 : i32, i32
  }
  func.func @transform_2(%arg0: i32, %arg1: i32) -> (i32, i32, i32) {
    %c0_i32 = arith.constant 0 : i32
    %c0_i32_0 = arith.constant 0 : i32
    %c0_i32_1 = arith.constant 0 : i32
    return %arg0, %c0_i32, %c0_i32_0 : i32, i32, i32
  }
  func.func @transform_3(%arg0: i32, %arg1: i32) -> (i32, i32, i32) {
    %c0_i32 = arith.constant 0 : i32
    %c0_i32_0 = arith.constant 0 : i32
    %c0_i32_1 = arith.constant 0 : i32
    return %arg0, %c0_i32, %c0_i32_0 : i32, i32, i32
  }
  func.func @transform_4(%arg0: i32, %arg1: i32) -> (i32, i32, i32) {
    %c0_i32 = arith.constant 0 : i32
    %c0_i32_0 = arith.constant 0 : i32
    %c0_i32_1 = arith.constant 0 : i32
    return %arg0, %c0_i32, %c0_i32_0 : i32, i32, i32
  }
  func.func @transform_5(%arg0: i32, %arg1: i32) -> (i32, i32, i32) {
    %c0_i32 = arith.constant 0 : i32
    %c0_i32_0 = arith.constant 0 : i32
    %c0_i32_1 = arith.constant 0 : i32
    return %arg0, %c0_i32, %c0_i32_0 : i32, i32, i32
  }
}

</mosaic_0001>

<bundles_post_ra>
// kernel: tpu_custom_call.1
= control target key start
LH: loop header
LB: loop body
LE: loop exit
PB: predicated region body
PF: predicated region fallthrough
CT: control target
= control target key end

     0   :  { %s1222_s0 = inlined_call_operand.hbm [shape: bf16[16,16], index: 0, kind: input, shape index: {}]   ;;  %s1223_s1 = inlined_call_operand.hbm [shape: bf16[16,128], index: 1, kind: input, shape index: {}]   ;;  %s1224_s2 = inlined_call_operand.hbm [shape: bf16[2,128,128], index: 2, kind: input, shape index: {}]   ;;  %s1225_s3 = inlined_call_operand.vmem [shape: f32[2,1,128], index: 3, kind: input, shape index: {}]   ;;  %s1226_s4 = inlined_call_operand.vmem [shape: f32[2,1,128], index: 4, kind: input, shape index: {}]   ;;  %s1227_s5 = inlined_call_operand.vmem [shape: f32[2,1,128], index: 5, kind: input, shape index: {}]   ;;  %s1228_s6 = inlined_call_operand.hbm [shape: f32[16,128], index: 6, kind: output, shape index: {}]  }
   0x1   :  { %1232 = sst [smem:[#allocation19_spill]] %s1222_s0 }
   0x2   :  { %11 = vsyncpa [#allocation6], 0 }
   0x3   :  { %12 = vsyncpa [#allocation8], 0 }
   0x4   :  { %14 = vsyncpa [#allocation8 + $0x1], 0  ;;  %s984_s21 = smov 0   ;;  %s986_s22 = smov 0  }
   0x5   :  { %s988_s23 = smov 0   ;;  %s990_s24 = smov 0  }
   0x6   :  { %s992_s25 = smov 0   ;;  %s994_s26 = smov 0  }
   0x7 LB: > { %s610_s27 = sadd.s32 4294967295, %s937_s26   ;;  %p63_p0 = scmp.ne.s32.totalorder %s921_s22, %s917_s21  ;;  %s937_s26 = sphi %s994_s26, %s20_s26   ;;  %s933_s25 = sphi %s992_s25, %s1246_s25   ;;  %s929_s24 = sphi %s990_s24, %s1245_s24   ;;  %s925_s23 = sphi %s988_s23, %s1244_s23   ;;  %s921_s22 = sphi %s986_s22, %s1243_s22   ;;  %s917_s21 = sphi %s984_s21, %s1242_s21  }
   0x8   : > { %p1014_p1 = scmp.eq.s32.totalorder %s610_s27, 0  ;;  %p697_p3 = scmp.ge.s32.totalorder %s937_s26, 1 }
   0x9   : > { %s939_s30 = smov [#allocation5]   ;;  %s1236_s0 = sld [smem:[#allocation19_spill]] }
   0xa   : > { %s1233_s28 = scalar_select %p1014_p1, 1, 0 }
   0xb   : > { %p1022_p4 = por %p1014_p1, %p63_p0  ;;  %s134_s7 = sshll.u32 %s939_s30, 4  ;;  %s135_s7 = int_to_ptr.vmem [resolvable:$true] %s134_s7 }
   0xc   : > { %p1028_p5 = pnand %p697_p3, %p1014_p1 }
   0xd   : > { %s1234_s29 = scalar_select %p1022_p4, 1, 0 }
   0xe   : > { %p773_p7 = pneg %p1028_p5 }
   0xf   : > { %s771_s11 = scalar_lea.hbm %s1236_s0, 128 }
  0x10   : > { %p772_p6 = scmp.ne.s32.totalorder %s1236_s0, %s771_s11  ;;  %p778_p10 = scmp.lt.u32.totalorder %s771_s11, %s1236_s0 }
  0x12   : > { %p774_p8 = pnand %p773_p7, %p772_p6 }
  0x14   : > { %p775_p9 = pneg %p774_p8 }
  0x16   : > { %p780_p11 = pnand %p778_p10, %p775_p9 }
  0x18   : > { %783 = shalt.err (!%p780_p11)
}
  0x19   : > { %s784_s16 = scalar_lea.vmem %s135_s7, 128  ;;  %p792_p3 = scmp.lt.s32.totalorder %s135_s7, %s135_s7 }
  0x1a   : > { %p785_p12 = scmp.ne.s32.totalorder %s135_s7, %s784_s16  ;;  %p793_p2 = scmp.lt.s32.totalorder %s784_s16, %s784_s16 }
  0x1c   : > { %p787_p13 = pnand %p785_p12, %p773_p7  ;;  %p794_p4 = por %p793_p2, %p792_p3 }
  0x1e   : > { %p788_p0 = pneg %p787_p13 }
  0x20   : > { %p795_p1 = pnand %p794_p4, %p788_p0 }
  0x22   : > { %798 = shalt.err (!%p795_p1)
}
  0x23   : > { %s940_s17 = smov 64   ;;  %s941_s18 = smov 4  }
  0x24   : > { %692 = dma.hbm_to_vmem [thread:$0]  (!%p1028_p5), %s1236_s0, 128, %s135_s7, [#allocation6], %s940_s17, %s940_s17, %s941_s18  }
  0x25   : > { %s29_s21 = sadd.s32 1, %s933_s25  ;;  %p56_p1 = scmp.ne.s32.totalorder %s925_s23, %s921_s22 }
  0x26   : > { %p31_p2 = scmp.ge.s32.totalorder %s29_s21, 2  ;;  %p57_p4 = scmp.eq.s32.totalorder %s937_s26, 0 }
  0x27   : > { %s50_s27 = sadd.s32 1, %s925_s23  ;;  %s148_s30 = sand.u32 1, %s925_s23  }
  0x28   : > { %s1248_s21 = smov (%p31_p2, %s29_s21), 0  ;;  %p58_p6 = por %p57_p4, %p56_p1 }
  0x29   : > { %p699_p7 = scmp.lt.s32.totalorder %s937_s26, 2  ;;  %s47_s8 = ssub.s32 %s933_s25, %s1248_s21 }
  0x2a   : > { %s615_s9 = sshll.u32 %s148_s30, 6  ;;  %p48_p8 = scmp.eq.s32.totalorder %s47_s8, 0 }
  0x2b   : > { %s642_s10 = sshll.u32 %s933_s25, 10  ;;  %s152_s11 = scalar_lea.vmem [#allocation7], %s615_s9 }
  0x2c   : > { %s159_s12 = sshll.u32 %s152_s11, 4  ;;  %s1069_s15 = scalar_lea.hbm %s1224_s2, %s642_s10  ;;  %s1071_s12 = int_to_ptr.vmem [resolvable:$true] %s159_s12 }
  0x2d   : > { %s1064_s13 = scalar_select %p48_p8, %s925_s23, %s50_s27  }
  0x2e   : > { %p1073_p5 = pnand %p699_p7, %p58_p6  ;;  %s1077_s19 = scalar_lea.sflag [#allocation8], %s148_s30 }
  0x2f   : > { %s799_s20 = scalar_lea.hbm %s1069_s15, 1024  ;;  %s804_s9 = scalar_lea.hbm %s1224_s2, 2048 }
  0x30   : > { %p800_p9 = scmp.ne.s32.totalorder %s1069_s15, %s799_s20  ;;  %p801_p10 = pneg %p1073_p5 }
  0x31   : > { %p805_p13 = scmp.lt.u32.totalorder %s1069_s15, %s1224_s2  ;;  %p806_p0 = scmp.lt.u32.totalorder %s804_s9, %s799_s20 }
  0x32   : > { %p802_p11 = pnand %p801_p10, %p800_p9  ;;  %p808_p1 = scmp.lt.u32.totalorder %s799_s20, %s1069_s15 }
  0x33   : > { %p807_p3 = por %p806_p0, %p805_p13 }
  0x34   : > { %p803_p12 = pneg %p802_p11 }
  0x35   : > { %p809_p2 = por %p808_p1, %p807_p3 }
  0x37   : > { %p810_p4 = pnand %p809_p2, %p803_p12 }
  0x39   : > { %813 = shalt.err (!%p810_p4)
}
  0x3a   : > { %s814_s30 = scalar_lea.vmem %s1071_s12, 1024  ;;  %s942_s7 = smov [#allocation7]  }
  0x3b   : > { %p815_p6 = scmp.ne.s32.totalorder %s1071_s12, %s814_s30  ;;  %s819_s14 = sshll.u32 %s942_s7, 4  ;;  %s820_s14 = int_to_ptr.vmem [resolvable:$false] %s819_s14 }
  0x3c   : > { %s821_s27 = scalar_lea.vmem %s820_s14, 2048  ;;  %p822_p9 = scmp.lt.s32.totalorder %s1071_s12, %s820_s14 }
  0x3d   : > { %p817_p7 = pnand %p815_p6, %p801_p10  ;;  %p823_p11 = scmp.lt.s32.totalorder %s821_s27, %s814_s30 }
  0x3f   : > { %p818_p8 = pneg %p817_p7  ;;  %p824_p13 = por %p823_p11, %p822_p9 }
  0x41   : > { %p825_p0 = pnand %p824_p13, %p818_p8 }
  0x43   : > { %828 = shalt.err (!%p825_p0)
}
  0x44   : > { %696 = dma.hbm_to_vmem [thread:$0]  (!%p1073_p5), %s1069_s15, 1024, %s1071_s12, %s1077_s19, %s940_s17, %s940_s17, %s941_s18  }
  0x45   : > { %p1238_p10 = scmp.lt.s32.totalorder %s937_s26, 1 }
  0x46   : > { %p1239_p12 = scmp.ne.s32.totalorder (!%p1238_p10), %s1233_s28, 0 }
  0x47   : > { %187 = sbr.rel (%p1238_p10) target bundleno = 889 (0x379), region = 40 }
  0x4e   : > { %902 = dma.done.wait (%p1239_p12), [#allocation6], 128  }
  0x4f   : > { %904 = vsyncadd (%p1239_p12), [#allocation6], 4294967168  ;;  %s193_s20 = sand.u32 1, %s921_s22   ;;  %p1240_p3 = scmp.ne.s32.totalorder %s1234_s29, 0 }
  0x50   : > { %s621_s16 = sshll.u32 %s193_s20, 6  ;;  %s194_s8 = scalar_lea.sflag [#allocation8], %s193_s20 }
  0x51   : > { %s1115_s9 = scalar_lea.vmem [#allocation7], %s621_s16 }
  0x52   : > { %906 = dma.done.wait (%p1240_p3), %s194_s8, 1024  }
  0x53   : > { %908 = vsyncadd (%p1240_p3), %s194_s8, 4294966272  ;;  %p226_p5 = scmp.lt.s32.totalorder %s929_s24, 1  ;;  %p236_p1 = scmp.eq.s32.totalorder %s929_s24, 0 }
  0x54   : > { %s943_s17 = smov [#allocation2]   ;;  %s829_s16 = scalar_lea.hbm %s1223_s1, 128 }
  0x55   : > { %s1124_s28 = scalar_select %p226_p5, %s929_s24, 1 }
  0x56   : > { %s249_s18 = sshll.u32 %s943_s17, 4  ;;  %p830_p2 = scmp.ne.s32.totalorder %s1223_s1, %s829_s16  ;;  %s250_s18 = int_to_ptr.vmem [resolvable:$true] %s249_s18 }
  0x57   : > { %s228_s19 = scalar_lea.vmem %s1225_s3, %s1124_s28  ;;  %s231_s11 = scalar_lea.vmem %s1226_s4, %s1124_s28 }
  0x58   : > { %s234_s14 = scalar_lea.vmem %s1227_s5, %s1124_s28  ;;  %p831_p4 = pnand %p830_p2, %p236_p1 }
  0x59   : > { %p835_p7 = scmp.lt.u32.totalorder %s829_s16, %s1223_s1 }
  0x5a   : > { %p832_p6 = pneg %p831_p4 }
  0x5c   : > { %p837_p8 = pnand %p835_p7, %p832_p6 }
  0x5e   : > { %840 = shalt.err (!%p837_p8)  }
  0x5f   : > { %s841_s15 = scalar_lea.vmem %s250_s18, 128  ;;  %s847_s10 = scalar_lea.vmem %s250_s18, 256 }
  0x60   : > { %p842_p9 = scmp.ne.s32.totalorder %s250_s18, %s841_s15  ;;  %p848_p0 = scmp.lt.s32.totalorder %s250_s18, %s250_s18 }
  0x61   : > { %p849_p10 = scmp.lt.s32.totalorder %s847_s10, %s841_s15 }
  0x62   : > { %p843_p11 = pnand %p842_p9, %p236_p1 }
  0x63   : > { %p850_p12 = por %p849_p10, %p848_p0 }
  0x64   : > { %p844_p13 = pneg %p843_p11 }
  0x66   : > { %p851_p3 = pnand %p850_p12, %p844_p13 }
  0x68   : > { %854 = shalt.err (!%p851_p3)  }
  0x69   : > { %687 = dma.hbm_to_vmem [thread:$0]  (%p236_p1), %s1223_s1, 128, %s250_s18, [#allocation4] }
  0x6a   : > { %910 = dma.done.wait (%p236_p1), [#allocation4], 128 }
  0x6b   : > { %912 = vsyncadd (%p236_p1), [#allocation4], 4294967168  ;;  %p257_p5 = scmp.lt.s32.totalorder %s929_s24, 0  ;;  %s258_s30 = ssub.s32 0, %s929_s24  ;;  %v944_v0 = vmov 0.0   ;;  %vm945_vm0 = vmmov 0   ;;  %v330_v10 = vlaneseq }
  0x6c   : > { %655 = vmatprep.subr.bf16.mxu0 %v944_v0  ;;  %s623_s7 = smin.u32 %s929_s24, %s258_s30  ;;  %657 = vmatprep.mubr.msk.bf16.mxu0 %vm945_vm0, %v944_v0  ;;  %v758_v2 = vld [vmem:[#allocation5] sm:$0xff]   ;;  %vm285_vm1 = vcmask 130048   ;;  %p630_p1 = scmp.ge.s32.totalorder %s929_s24, 1 }
  0x6d   : > { %s260_s27 = sand.u32 1, %s623_s7   ;;  %v625_v3 = vld [vmem:[%s228_s19] ss:$0 sm:$0xff]  ;;  %v331_v11 = vand.u32 127, %v330_v10  ;;  %v763_v40 = vld [vmem:[%s1115_s9] sm:$0xff] (!%p630_p1)   ;;  %v946_v41 = vmov (!%p630_p1), 0.0  }
  0x6e   : > { %s261_s20 = ssub.s32 0, %s260_s27  ;;  %v628_v29 = vld [vmem:[%s231_s11] ss:$0 sm:$0xff]  ;;  %v764_v42 = vld [vmem:[%s1115_s9 + $0x8] sm:$0xff] (!%p630_p1)   ;;  %vm947_vm3 = vmmov (!%p630_p1), 0   ;;  %v765_v43 = vld [vmem:[%s1115_s9 + $0x10] sm:$0xff] (!%p630_p1)  }
  0x6f   : > { %s1250_s20 = smov (!%p257_p5, %s261_s20), %s260_s27  ;;  %vm332_vm2 = vcmp.lt.s32.totalorder %v331_v11, 32  ;;  %v629_v31 = vld [vmem:[%s234_s14] ss:$0 sm:$0xff]  ;;  %v767_v45 = vld [vmem:[%s1115_s9 + $0x20] sm:$0xff] (!%p630_p1)   ;;  %v768_v46 = vld [vmem:[%s1115_s9 + $0x28] sm:$0xff] (!%p630_p1)  }
  0x70   : > { %s624_s18 = sshll.u32 %s1250_s20, 3  ;;  %v766_v44 = vld [vmem:[%s1115_s9 + $0x18] sm:$0xff] (!%p630_p1)   ;;  %v769_v47 = vld [vmem:[%s1115_s9 + $0x30] sm:$0xff] (!%p630_p1)   ;;  %s490_s28 = ssub.s32 (!%p630_p1), 1, %s1250_s20 }
  0x71   : > { %s271_s16 = scalar_lea.vmem [#allocation2], %s624_s18  ;;  %v770_v48 = vld [vmem:[%s1115_s9 + $0x38] sm:$0xff] (!%p630_p1)   ;;  %s639_s11 = sshll.u32 (!%p630_p1), %s490_s28, 3 }
  0x72   : > { %v272_v1 = vld [vmem:[%s271_s16] sm:$0xff]  ;;  %s495_s14 = scalar_lea.vmem (!%p630_p1), [#allocation2], %s639_s11 }
  0x73   : > { %656 = vmatpush3.bf16.msra.mxu0 %v272_v1 }
  0x74   : > { %661 = vmatprep.subr.bf16.mxu0 (!%p630_p1), %v946_v41 }
  0x76   : > { %658 = vmatmul.mubr.msk.bf16.vlgmr.msra.gmra.mrb[0].mxu0 %vm285_vm1, %v758_v2 }
  0x77   : > { %662 = vmatpush3.bf16.msra.mxu0 (!%p630_p1), %v763_v40  ;;  %677 = vmatprep.mubr.msk.bf16.mxu0 (!%p630_p1), %vm947_vm3, %v946_v41 }
  0x78   : > { %663 = vmatprep.subr.bf16.mxu0 (!%p630_p1), %v946_v41 }
  0x7b   : > { %664 = vmatpush3.bf16.msra.mxu0 (!%p630_p1), %v764_v42 }
  0x7c   : > { %665 = vmatprep.subr.bf16.mxu0 (!%p630_p1), %v946_v41 }
  0x7f   : > { %666 = vmatpush3.bf16.msra.mxu0 (!%p630_p1), %v765_v43 }
  0x80   : > { %667 = vmatprep.subr.bf16.mxu0 (!%p630_p1), %v946_v41 }
  0x83   : > { %668 = vmatpush3.bf16.msra.mxu0 (!%p630_p1), %v766_v44 }
  0x84   : > { %669 = vmatprep.subr.bf16.mxu0 (!%p630_p1), %v946_v41 }
  0x87   : > { %670 = vmatpush3.bf16.msra.mxu0 (!%p630_p1), %v767_v45 }
  0x88   : > { %671 = vmatprep.subr.bf16.mxu0 (!%p630_p1), %v946_v41 }
  0x8b   : > { %672 = vmatpush3.bf16.msra.mxu0 (!%p630_p1), %v768_v46 }
  0x8c   : > { %673 = vmatprep.subr.bf16.mxu0 (!%p630_p1), %v946_v41 }
  0x8f   : > { %674 = vmatpush3.bf16.msra.mxu0 (!%p630_p1), %v769_v47 }
  0x90   : > { %675 = vmatprep.subr.bf16.mxu0 (!%p630_p1), %v946_v41 }
  0x93   : > { %676 = vmatpush3.bf16.msra.mxu0 (!%p630_p1), %v770_v48 }
 0x149   : > { %v323_v4 = vpop.f32.mrb[0].mxu0 }
 0x14a   : > { %v324_v5 = vadd.f32 %v625_v3, %v323_v4  ;;  %v659_v6 = vpop.f32.mrb[1].mxu0 }
 0x14b   : > { %v326_v7 = vpop.f32.mrb[2].mxu0 }
 0x14c   : > { %333 = vadd.xlane.f32.xlu0 %v324_v5  ;;  %v660_v8 = vpop.f32.mrb[3].mxu0  ;;  %v327_v9 = vadd.f32 %v625_v3, %v326_v7 }
 0x150   : > { %335 = vadd.xlane.f32.xlu0 %v327_v9 }
 0x1d9   : > { %v334_v12 = vpop.xlane.xlu0 %333 }
 0x1da   : > { %v337_v13 = vmul.f32 0.03125, %v334_v12 }
 0x1dc   : > { %v339_v14 = vsub.f32 %v324_v5, %v337_v13 }
 0x1dd   : > { %v336_v15 = vpop.xlane.xlu0 %335 }
 0x1de   : > { %v338_v16 = vmul.f32 0.03125, %v336_v15  ;;  %v343_v17 = vsel %vm332_vm2, %v339_v14, 0.0 }
 0x1df   : > { %v345_v18 = vmul.f32 %v343_v17, %v343_v17 }
 0x1e0   : > { %v340_v19 = vsub.f32 %v327_v9, %v338_v16 }
 0x1e1   : > { %347 = vadd.xlane.f32.xlu1 %v345_v18 }
 0x1e2   : > { %v344_v20 = vsel %vm332_vm2, %v340_v19, 0.0 }
 0x1e3   : > { %v346_v21 = vmul.f32 %v344_v20, %v344_v20 }
 0x1e5   : > { %349 = vadd.xlane.f32.xlu1 %v346_v21 }
 0x26e   : > { %v348_v22 = vpop.xlane.xlu1 %347 }
 0x26f   : > { %v351_v23 = vmul.f32 0.03125, %v348_v22 }
 0x271   : > { %v353_v24 = vadd.f32 1e-05, %v351_v23 }
 0x272   : > { %v350_v25 = vpop.xlane.xlu1 %349 }
 0x273   : > { %759 = vrsqrt.f32 %v353_v24  ;;  %v352_v26 = vmul.f32 0.03125, %v350_v25 }
 0x275   : > { %v354_v27 = vadd.f32 1e-05, %v352_v26 }
 0x277   : > { %761 = vrsqrt.f32 %v354_v27 }
 0x27d   : > { %v760_v28 = vpop.eup %759 }
 0x27e   : > { %v357_v30 = vmul.f32 %v760_v28, %v343_v17 }
 0x280   : > { %v366_v32 = vmul.f32 %v628_v29, %v357_v30 }
 0x281   : > { %v762_v33 = vpop.eup %761 }
 0x282   : > { %v375_v34 = vadd.f32 %v629_v31, %v366_v32  ;;  %v358_v35 = vmul.f32 %v762_v33, %v344_v20  ;;  %382 = sbr.rel (%p630_p1) target bundleno = 869 (0x365), region = 60 }
 0x284   : > { %v377_v36 = vmax.f32 %v375_v34, 0.0  ;;  %v367_v37 = vmul.f32 %v628_v29, %v358_v35 }
 0x286   : > { %v376_v38 = vadd.f32 %v629_v31, %v367_v37 }
 0x288   : > { %v378_v39 = vmax.f32 %v376_v38, 0.0 }
 0x28a   : > { %v383_v49 = vpack.c.bf16 %v378_v39, %v377_v36 }
 0x28c   : > { %678 = vmatmul.mubr.bf16.vlgmr.msra.gmra.mrb[0].mxu0 %v383_v49 }
 0x35f   : > { %v482_v50 = vpop.f32.mrb[0].mxu0 }
 0x360   : > { %v679_v51 = vpop.f32.mrb[1].mxu0 }
 0x361   : > { %v485_v52 = vpop.f32.mrb[2].mxu0 }
 0x362   : > { %v489_v53 = vpack.c.bf16 %v485_v52, %v482_v50  ;;  %v680_v54 = vpop.f32.mrb[3].mxu0 }
 0x364   : > { %496 = vst [vmem:[%s495_s14] sm:$0xff] %v489_v53 }
 0x365 PF: > { %p640_p2 = scmp.ne.s32.totalorder %s929_s24, 1 }
 0x366   : > { %501 = vst [vmem:[#allocation3] sm:$0xff] (!%p640_p2), %v377_v36  ;;  %502 = vst [vmem:[#allocation3 + $0x8] sm:$0xff] (!%p640_p2), %v378_v39  ;;  %s948_s9 = smov (!%p640_p2), [#allocation3]  }
 0x367   : > { %500 = sbr.rel (%p640_p2) target bundleno = 889 (0x379), region = 64  ;;  %s512_s0 = sshll.u32 (!%p640_p2), %s948_s9, 4  ;;  %s513_s0 = int_to_ptr.vmem [resolvable:$true] %s512_s0 }
 0x368   : > { %s855_s29 = scalar_lea.vmem (!%p640_p2), %s513_s0, 256  ;;  %p860_p6 = scmp.lt.s32.totalorder (!%p640_p2), %s513_s0, %s513_s0 }
 0x369   : > { %p856_p4 = scmp.ne.s32.totalorder (!%p640_p2), %s513_s0, %s855_s29  ;;  %p861_p7 = scmp.lt.s32.totalorder (!%p640_p2), %s855_s29, %s855_s29 }
 0x36b   : > { %p862_p8 = por (!%p640_p2), %p861_p7, %p860_p6 }
 0x36d   : > { %p863_p9 = pnand (!%p640_p2), %p862_p8, %p856_p4 }
 0x36f   : > { %866 = shalt.err (!%p863_p9)  }
 0x370   : > { %s867_s27 = scalar_lea.hbm %s1228_s6, 256 }
 0x371   : > { %p868_p11 = scmp.ne.s32.totalorder %s1228_s6, %s867_s27  ;;  %p871_p13 = scmp.lt.u32.totalorder %s867_s27, %s1228_s6 }
 0x373   : > { %p873_p0 = pnand %p871_p13, %p868_p11 }
 0x375   : > { %876 = shalt.err (!%p873_p0)  }
 0x376   : > { %515 = dma.vmem_to_hbm [thread:$0]  %s513_s0, 256, %s1228_s6, [#allocation4] }
 0x377   : > { %913 = dma.done.wait [#allocation4], 256 }
 0x378   : > { %914 = vsyncadd [#allocation4], 4294967040 }
 0x379 PF: > { %s20_s26 = sadd.s32 1, %s937_s26   ;;  %s1241_s19 = smov %s1248_s21 }
 0x37a   : > { %p17_p10 = scmp.ge.s32.totalorder %s20_s26, 3   ;;  %s1242_s21 = smov %s921_s22 }
 0x37b   : > { %s1243_s22 = smov %s925_s23  ;;  %s1244_s23 = smov %s1064_s13 }
 0x37c   : > { %s1245_s24 = smov %s933_s25  ;;  %s1246_s25 = smov %s1241_s19 }
 0x37d   :  { %19 = sbr.rel (!%p17_p10) target bundleno = 7 (0x7), region = 102 }
 0x384   :  { %519 = vsyncpa [#allocation6], 1 }
 0x385   :  { %521 = vsyncpa [#allocation6 + $0x1], 1 }
 0x386   :  { %522 = vsyncpa [#allocation8], 1 }
 0x387   :  { %524 = vsyncpa [#allocation8 + $0x1], 1 }
 0x388   :  { %525 = vsyncmov [#allocation4] }
 0x38b   :  { %s526_s12 = vpop.sfrf %525 }
 0x38c   :  { %p641_p12 = scmp.ne.s32.totalorder %s526_s12, 0 }
 0x38e   :  { %530 = shalt.err (%p641_p12)  }

</bundles_post_ra>
